<compile_context>
chip_gen: v5e
topology: v5e:2x2
jax: 0.10.0
libtpu: 0.0.40
codegen_flags: <defaults>
</compile_context>

<pallas_src>
import jax
import jax.numpy as jnp
from jax.experimental import pallas as pl
from jax.experimental.pallas import tpu as pltpu

LANE = 128       # TPU lane width (last dim of a vreg)
SUBLANE = 8      # f32 sublane width (second-to-last dim of a vreg)
HIDDEN = 128     # Actor hidden width (already lane-aligned)
NEG_INF = -1e30  # finite "-inf" used to mask padded softmax lanes


def _round_up(x, m):
    return ((x + m - 1) // m) * m


# --------------------------------------------------------------------------
# Kernel body: one batch tile -> linear1 + relu + linear2 + softmax
# --------------------------------------------------------------------------
def actor_kernel(x_ref, w1_ref, b1_ref, w2_ref, b2_ref, o_ref):
    # ---- Linear 1 + ReLU (MXU matmul, f32 accumulate; VPU elementwise) ----
    h = jnp.dot(x_ref[...], w1_ref[...], preferred_element_type=jnp.float32)
    h = jnp.maximum(h + b1_ref[...], 0.0)                 # (TB,128)+(1,128)

    # ---- Linear 2, lane-dense padded N; padded lanes carry b2 == -1e30 ----
    logits = jnp.dot(h, w2_ref[...], preferred_element_type=jnp.float32)
    logits = logits + b2_ref[...]                         # (TB,Np)+(1,Np)

    # ---- Numerically stable softmax over the padded last axis ----
    # Padded lanes have logits ~ -1e30 -> exp underflows to exactly 0, so the
    # real columns still normalize to 1.
    m = jnp.max(logits, axis=-1, keepdims=True)
    e = jnp.exp(logits - m)
    s = jnp.sum(e, axis=-1, keepdims=True)
    # Exact divide: rows sum to 1 within f32 rounding (approx reciprocal was
    # the source of the previous >1e-3 normalization error).
    o_ref[...] = (e / s).astype(o_ref.dtype)


# --------------------------------------------------------------------------
# One-time parameter preparation (hoisted out of the per-call path)
# --------------------------------------------------------------------------
def prepare_params(w1, b1, w2, b2):
    """Pad weights/biases once.  w1:(K,128) b1:(1,128) w2:(128,out) b2:(1,out)
    (weights stored transposed vs. torch.nn.Linear so matmuls are row-major).
    Returns ((w1, b1, w2_padded, b2_padded_masked), out_dim)."""
    K, H = w1.shape
    assert H == HIDDEN
    out_dim = w2.shape[1]
    n_pad = _round_up(out_dim, LANE)

    f32 = jnp.float32
    w1_p = jnp.asarray(w1, f32)                                  # (K,128)
    b1_p = jnp.asarray(b1, f32).reshape(1, H)                    # (1,128)
    w2_p = jnp.zeros((H, n_pad), f32).at[:, :out_dim].set(jnp.asarray(w2, f32))
    # Padded output lanes get a very negative bias -> softmax prob exactly 0.
    b2_p = jnp.full((1, n_pad), NEG_INF, f32).at[:, :out_dim].set(
        jnp.asarray(b2, f32).reshape(1, out_dim))
    return (w1_p, b1_p, w2_p, b2_p), out_dim


# --------------------------------------------------------------------------
# Forward wrapper
# --------------------------------------------------------------------------
def actor_forward(state, params, *, out_dim, block_b=1024):
    """state: (B, input_dim) -> (B, out_dim) softmax probabilities (f32)."""
    w1_p, b1_p, w2_p, b2_p = params
    B, K = state.shape
    Kw, H = w1_p.shape
    assert Kw == K and H == HIDDEN
    n_pad = w2_p.shape[1]

    f32 = jnp.float32
    x = state.astype(f32)

    # Only pad the batch to a sublane multiple when actually needed.
    B_pad = _round_up(B, SUBLANE)
    if B_pad != B:
        x = jnp.pad(x, ((0, B_pad - B), (0, 0)))

    # Batch tile:
    #   * large batches: 1024-row tiles (~85% of HBM roofline, few grid steps)
    #   * mid batches: split ~in half so the "parallel" grid axis feeds both
    #     v7x TensorCores (harmless on 1-TC v5e/v6e)
    #   * tiny batches: single tile
    if B_pad >= 2 * block_b:
        TB = block_b
    elif B_pad >= 256:
        TB = min(block_b, _round_up(pl.cdiv(B_pad, 2), SUBLANE))
    else:
        TB = B_pad
    grid = (pl.cdiv(B_pad, TB),)   # ragged last tile handled by Pallas

    # Advisory cost estimate for XLA scheduling when embedded in a larger jit.
    flops = 2 * B_pad * K * H + 2 * B_pad * H * n_pad + 5 * B_pad * n_pad
    bytes_accessed = 4 * (B_pad * K + K * H + H + H * n_pad + n_pad
                          + B_pad * n_pad)

    out_p = pl.pallas_call(
        actor_kernel,
        out_shape=jax.ShapeDtypeStruct((B_pad, n_pad), f32),
        grid=grid,
        in_specs=[
            # state tile streams over the batch grid axis; K is the full dim
            # (no contraction padding -> minimal HBM traffic)
            pl.BlockSpec((TB, K), lambda i: (i, 0)),
            # weights / biases: constant index_map -> stay resident in VMEM
            pl.BlockSpec((K, H), lambda i: (0, 0)),
            pl.BlockSpec((1, H), lambda i: (0, 0)),
            pl.BlockSpec((H, n_pad), lambda i: (0, 0)),
            pl.BlockSpec((1, n_pad), lambda i: (0, 0)),
        ],
        out_specs=pl.BlockSpec((TB, n_pad), lambda i: (i, 0)),
        compiler_params=pltpu.CompilerParams(
            dimension_semantics=("parallel",)),
        cost_estimate=pl.CostEstimate(
            flops=flops,
            transcendentals=B_pad * n_pad,
            bytes_accessed=bytes_accessed),
    )(x, w1_p, b1_p, w2_p, b2_p)

    # Drop batch padding and the masked probability-0 lanes.
    return out_p[:B, :out_dim]


def init_actor_params(key, input_dim, output_dim, hidden=HIDDEN):
    """Deterministic init mirroring torch.nn.Linear default U(-1/sqrt(fan_in), ...)."""
    k1, k2, k3, k4 = jax.random.split(key, 4)
    lim1 = 1.0 / jnp.sqrt(jnp.float32(input_dim))
    lim2 = 1.0 / jnp.sqrt(jnp.float32(hidden))
    w1 = jax.random.uniform(k1, (input_dim, hidden), jnp.float32, -lim1, lim1)
    b1 = jax.random.uniform(k2, (1, hidden), jnp.float32, -lim1, lim1)
    w2 = jax.random.uniform(k3, (hidden, output_dim), jnp.float32, -lim2, lim2)
    b2 = jax.random.uniform(k4, (1, output_dim), jnp.float32, -lim2, lim2)
    return w1, b1, w2, b2


if __name__ == "__main__":
    key = jax.random.PRNGKey(0)
    batch, input_dim, output_dim = 8, 32, 8

    k_x, k_p = jax.random.split(key)
    state = jax.random.normal(k_x, (batch, input_dim), jnp.float32)
    w1, b1, w2, b2 = init_actor_params(k_p, input_dim, output_dim)

    # One-time weight padding (outside the per-step forward path).
    params, out_dim = prepare_params(w1, b1, w2, b2)

    actor = jax.jit(actor_forward, static_argnames=("out_dim", "block_b"))
    probs = actor(state, params, out_dim=out_dim)
    probs = jax.block_until_ready(probs)

    # Pure-JAX reference (same math, no Pallas).
    h_ref = jnp.maximum(state @ w1 + b1, 0.0)
    ref = jax.nn.softmax(h_ref @ w2 + b2, axis=-1)

    assert probs.shape == (batch, output_dim)
    assert bool(jnp.allclose(jnp.sum(probs, axis=-1), 1.0, atol=1e-4))
    assert bool(jnp.allclose(probs, ref, atol=1e-3, rtol=1e-3))

    print("KERNEL_OK")
</pallas_src>

<mosaic_0001>
module attributes {stable_mosaic.version = 11 : i64} {
  func.func @actor_kernel(%arg0: i32, %arg1: memref<8x32xf32, #tpu.memory_space<vmem>>, %arg2: memref<32x128xf32, #tpu.memory_space<vmem>>, %arg3: memref<1x128xf32, #tpu.memory_space<vmem>>, %arg4: memref<128x128xf32, #tpu.memory_space<vmem>>, %arg5: memref<1x128xf32, #tpu.memory_space<vmem>>, %arg6: memref<8x128xf32, #tpu.memory_space<vmem>>) attributes {dimension_semantics = [#tpu.dimension_semantics<parallel>], iteration_bounds = array<i64: 1>, scalar_prefetch = 0 : i64, scratch_operands = 0 : i64, tpu.core_type = #tpu.core_type<tc>, window_params = [{transform_indices = @transform_0, window_bounds = array<i64: 8, 32>}, {pipeline_mode = #tpu.pipeline_mode<synchronous>, transform_indices = @transform_1, window_bounds = array<i64: 32, 128>}, {pipeline_mode = #tpu.pipeline_mode<synchronous>, transform_indices = @transform_2, window_bounds = array<i64: 1, 128>}, {pipeline_mode = #tpu.pipeline_mode<synchronous>, transform_indices = @transform_3, window_bounds = array<i64: 128, 128>}, {pipeline_mode = #tpu.pipeline_mode<synchronous>, transform_indices = @transform_4, window_bounds = array<i64: 1, 128>}, {transform_indices = @transform_5, window_bounds = array<i64: 8, 128>}]} {
    %c0 = arith.constant 0 : index
    %c0_0 = arith.constant 0 : index
    %0 = vector.load %arg1[%c0, %c0_0] : memref<8x32xf32, #tpu.memory_space<vmem>>, vector<8x32xf32>
    %c0_1 = arith.constant 0 : index
    %c0_2 = arith.constant 0 : index
    %1 = vector.load %arg2[%c0_1, %c0_2] : memref<32x128xf32, #tpu.memory_space<vmem>>, vector<32x128xf32>
    %cst = arith.constant dense<0.000000e+00> : vector<8x128xf32>
    %2 = tpu.matmul %0, %1, %cst {dimension_numbers = #tpu.dot_dimension_numbers<[1], [0], [0], [1], [0, 0, 1, 1], [], []>} : vector<8x32xf32>, vector<32x128xf32>, vector<8x128xf32> -> vector<8x128xf32>
    %c0_3 = arith.constant 0 : index
    %c0_4 = arith.constant 0 : index
    %3 = vector.load %arg3[%c0_3, %c0_4] : memref<1x128xf32, #tpu.memory_space<vmem>>, vector<1x128xf32>
    %4 = vector.broadcast %3 : vector<1x128xf32> to vector<8x128xf32>
    %5 = arith.addf %2, %4 : vector<8x128xf32>
    %cst_5 = arith.constant 0.000000e+00 : f32
    %6 = vector.broadcast %cst_5 : f32 to vector<8x128xf32>
    %7 = arith.maximumf %5, %6 : vector<8x128xf32>
    %c0_6 = arith.constant 0 : index
    %c0_7 = arith.constant 0 : index
    %8 = vector.load %arg4[%c0_6, %c0_7] : memref<128x128xf32, #tpu.memory_space<vmem>>, vector<128x128xf32>
    %cst_8 = arith.constant dense<0.000000e+00> : vector<8x128xf32>
    %9 = tpu.matmul %7, %8, %cst_8 {dimension_numbers = #tpu.dot_dimension_numbers<[1], [0], [0], [1], [0, 0, 1, 1], [], []>} : vector<8x128xf32>, vector<128x128xf32>, vector<8x128xf32> -> vector<8x128xf32>
    %c0_9 = arith.constant 0 : index
    %c0_10 = arith.constant 0 : index
    %10 = vector.load %arg5[%c0_9, %c0_10] : memref<1x128xf32, #tpu.memory_space<vmem>>, vector<1x128xf32>
    %11 = vector.broadcast %10 : vector<1x128xf32> to vector<8x128xf32>
    %12 = arith.addf %9, %11 : vector<8x128xf32>
    %cst_11 = arith.constant dense<0xFF800000> : vector<8xf32>
    %13 = vector.multi_reduction <maximumf>, %12, %cst_11 [1] : vector<8x128xf32> to vector<8xf32>
    %14 = vector.shape_cast %13 : vector<8xf32> to vector<8x1xf32>
    %15 = vector.broadcast %14 : vector<8x1xf32> to vector<8x128xf32>
    %16 = arith.subf %12, %15 : vector<8x128xf32>
    %17 = math.exp %16 : vector<8x128xf32>
    %cst_12 = arith.constant dense<0.000000e+00> : vector<8xf32>
    %18 = vector.multi_reduction <add>, %17, %cst_12 [1] : vector<8x128xf32> to vector<8xf32>
    %19 = vector.shape_cast %18 : vector<8xf32> to vector<8x1xf32>
    %20 = vector.broadcast %19 : vector<8x1xf32> to vector<8x128xf32>
    %21 = arith.divf %17, %20 : vector<8x128xf32>
    %c0_13 = arith.constant 0 : index
    %c0_14 = arith.constant 0 : index
    %22 = vector.load %arg6[%c0_13, %c0_14] : memref<8x128xf32, #tpu.memory_space<vmem>>, vector<8x128xf32>
    tpu.vector_store %arg6[%c0_13, %c0_14], %21 {strides = array<i32>} : memref<8x128xf32, #tpu.memory_space<vmem>>, vector<8x128xf32>,
    return
  }
  func.func @transform_0(%arg0: i32) -> (i32, i32) {
    %c0_i32 = arith.constant 0 : i32
    %c0_i32_0 = arith.constant 0 : i32
    return %arg0, %c0_i32 : i32, i32
  }
  func.func @transform_1(%arg0: i32) -> (i32, i32) {
    %c0_i32 = arith.constant 0 : i32
    %c0_i32_0 = arith.constant 0 : i32
    %c0_i32_1 = arith.constant 0 : i32
    return %c0_i32, %c0_i32_0 : i32, i32
  }
  func.func @transform_2(%arg0: i32) -> (i32, i32) {
    %c0_i32 = arith.constant 0 : i32
    %c0_i32_0 = arith.constant 0 : i32
    %c0_i32_1 = arith.constant 0 : i32
    return %c0_i32, %c0_i32_0 : i32, i32
  }
  func.func @transform_3(%arg0: i32) -> (i32, i32) {
    %c0_i32 = arith.constant 0 : i32
    %c0_i32_0 = arith.constant 0 : i32
    %c0_i32_1 = arith.constant 0 : i32
    return %c0_i32, %c0_i32_0 : i32, i32
  }
  func.func @transform_4(%arg0: i32) -> (i32, i32) {
    %c0_i32 = arith.constant 0 : i32
    %c0_i32_0 = arith.constant 0 : i32
    %c0_i32_1 = arith.constant 0 : i32
    return %c0_i32, %c0_i32_0 : i32, i32
  }
  func.func @transform_5(%arg0: i32) -> (i32, i32) {
    %c0_i32 = arith.constant 0 : i32
    %c0_i32_0 = arith.constant 0 : i32
    return %arg0, %c0_i32 : i32, i32
  }
}

</mosaic_0001>

<bundles_post_ra>
// kernel: actor_forward.1
= control target key start
LH: loop header
LB: loop body
LE: loop exit
PB: predicated region body
PF: predicated region fallthrough
CT: control target
= control target key end

     0   :  { %10 = vsyncpa [#allocation3], 0  ;;  %s350_s0 = inlined_call_operand.hbm [shape: f32[8,32], index: 0, kind: input, shape index: {}]   ;;  %s351_s1 = inlined_call_operand.hbm [shape: f32[32,128], index: 1, kind: input, shape index: {}]   ;;  %s352_s2 = inlined_call_operand.vmem [shape: f32[1,128], index: 2, kind: input, shape index: {}]   ;;  %s353_s3 = inlined_call_operand.hbm [shape: f32[128,128], index: 3, kind: input, shape index: {}]   ;;  %s354_s4 = inlined_call_operand.vmem [shape: f32[1,128], index: 4, kind: input, shape index: {}]   ;;  %s355_s5 = inlined_call_operand.hbm [shape: f32[8,128], index: 5, kind: output, shape index: {}]  }
   0x1   :  { %11 = vsyncpa [#allocation6], 0  ;;  %s28_s20 = sshll.u32 %s351_s1, 4  ;;  %s29_s20 = int_to_ptr.hbm [resolvable:$true] %s28_s20 }
   0x2   :  { %12 = vsyncpa [#allocation4], 0  ;;  %s296_s21 = smov [#allocation5]   ;;  %s18_s25 = sshll.u32 %s350_s0, 4  ;;  %s19_s25 = int_to_ptr.hbm [resolvable:$true] %s18_s25 }
   0x3   :  { %s30_s22 = sshll.u32 %s296_s21, 4  ;;  %s297_s26 = smov 128   ;;  %s31_s22 = int_to_ptr.vmem [resolvable:$true] %s30_s22 }
   0x4   :  { %s298_s27 = smov 8   ;;  %s299_s28 = smov [#allocation2]  }
   0x5   :  { %36 = dma.hbm_to_vmem [thread:$0]  %s29_s20, 512, %s31_s22, [#allocation6], %s297_s26, %s297_s26, %s298_s27  }
   0x6   :  { %s20_s29 = sshll.u32 %s299_s28, 4  ;;  %s43_s7 = sshll.u32 %s353_s3, 4  ;;  %s21_s29 = int_to_ptr.vmem [resolvable:$true] %s20_s29  ;;  %s44_s7 = int_to_ptr.hbm [resolvable:$true] %s43_s7 }
   0x7   :  { %23 = dma.hbm_to_vmem [thread:$0]  %s19_s25, 128, %s21_s29, [#allocation3]  }
   0x8   :  { %s300_s1 = smov [#allocation7]  }
   0x9   :  { %s45_s8 = sshll.u32 %s300_s1, 4  ;;  %s46_s8 = int_to_ptr.vmem [resolvable:$true] %s45_s8 }
   0xa   :  { %51 = dma.hbm_to_vmem [thread:$0]  %s44_s7, 2048, %s46_s8, [#allocation6], %s297_s26, %s297_s26, %s298_s27  }
   0xb   :  { %290 = dma.done.wait [#allocation3], 128  }
   0xc   :  { %291 = vsyncadd [#allocation3], 4294967168 }
   0xd   :  { %292 = dma.done.wait [#allocation6], 2560  }
   0xe   :  { %293 = vsyncadd [#allocation6], 4294964736  ;;  %v70_v0 = vld [vmem:[#allocation5 + $0x18] sm:$0xff]  ;;  %v69_v1 = vld [vmem:[#allocation5 + $0x10] sm:$0xff]  ;;  %vm75_vm0 = vcmask 261120   ;;  %s170_s13 = sshll.u32 %s355_s5, 4  ;;  %s171_s13 = int_to_ptr.hbm [resolvable:$true] %s170_s13 }
   0xf   :  { %91 = vmatpush.msra.mxu0 %v70_v0  ;;  %v115_v2 = vld [vmem:[#allocation7 + $0x78] sm:$0xff]  ;;  %v68_v3 = vld [vmem:[#allocation5 + $0x8] sm:$0xff]  ;;  %v114_v4 = vld [vmem:[#allocation7 + $0x70] sm:$0xff] }
  0x10   :  { %120 = vmatpush.msra.mxu1 %v115_v2  ;;  %v113_v5 = vld [vmem:[#allocation7 + $0x68] sm:$0xff]  ;;  %v67_v6 = vld [vmem:[#allocation5] sm:$0xff]  ;;  %v66_v7 = vld [vmem:[#allocation2] sm:$0xff] }
  0x11   :  { %92 = vmatpush.msra.mxu0 %v69_v1  ;;  %v112_v8 = vld [vmem:[#allocation7 + $0x60] sm:$0xff]  ;;  %v111_v9 = vld [vmem:[#allocation7 + $0x58] sm:$0xff]  ;;  %v110_v10 = vld [vmem:[#allocation7 + $0x50] sm:$0xff] }
  0x12   :  { %121 = vmatpush.msra.mxu1 %v114_v4  ;;  %v109_v11 = vld [vmem:[#allocation7 + $0x48] sm:$0xff]  ;;  %v108_v12 = vld [vmem:[#allocation7 + $0x40] sm:$0xff]  ;;  %v107_v13 = vld [vmem:[#allocation7 + $0x38] sm:$0xff] }
  0x13   :  { %93 = vmatpush.msra.mxu0 %v68_v3  ;;  %v106_v14 = vld [vmem:[#allocation7 + $0x30] sm:$0xff]  ;;  %v105_v15 = vld [vmem:[#allocation7 + $0x28] sm:$0xff]  ;;  %v104_v16 = vld [vmem:[#allocation7 + $0x20] sm:$0xff] }
  0x14   :  { %122 = vmatpush.msra.mxu1 %v113_v5  ;;  %v103_v17 = vld [vmem:[#allocation7 + $0x18] sm:$0xff]  ;;  %v102_v18 = vld [vmem:[#allocation7 + $0x10] sm:$0xff]  ;;  %v101_v19 = vld [vmem:[#allocation7 + $0x8] sm:$0xff] }
  0x15   :  { %94 = vmatpush.msra.mxu0 %v67_v6  ;;  %v100_v20 = vld [vmem:[#allocation7] sm:$0xff]  ;;  %v188_v21 = vld [vmem:[%s352_s2] ss:$0 sm:$0xff]  ;;  %s301_s2 = smov [#allocation8]  }
  0x16   :  { %181 = vmatmul.msk.f32.vlgmr.msra.gmra.mxu0 %vm75_vm0, %v66_v7  ;;  %123 = vmatpush.msra.mxu1 %v112_v8  ;;  %v189_v25 = vld [vmem:[%s354_s4] ss:$0 sm:$0xff]  ;;  %s168_s4 = sshll.u32 %s301_s2, 4  ;;  %s169_s4 = int_to_ptr.vmem [resolvable:$true] %s168_s4 }
  0x18   :  { %124 = vmatpush.msra.mxu1 %v111_v9 }
  0x1a   :  { %125 = vmatpush.msra.mxu1 %v110_v10 }
  0x1c   :  { %126 = vmatpush.msra.mxu1 %v109_v11 }
  0x1e   :  { %127 = vmatpush.msra.mxu1 %v108_v12 }
  0x20   :  { %128 = vmatpush.msra.mxu1 %v107_v13 }
  0x22   :  { %129 = vmatpush.msra.mxu1 %v106_v14 }
  0x24   :  { %130 = vmatpush.msra.mxu1 %v105_v15 }
  0x26   :  { %131 = vmatpush.msra.mxu1 %v104_v16 }
  0x28   :  { %132 = vmatpush.msra.mxu1 %v103_v17 }
  0x2a   :  { %133 = vmatpush.msra.mxu1 %v102_v18 }
  0x2c   :  { %134 = vmatpush.msra.mxu1 %v101_v19 }
  0x2e   :  { %135 = vmatpush.msra.mxu1 %v100_v20 }
  0x93   :  { %v96_v22 = vpop.f32.mrf.mxu0 }
  0x94   :  { %v97_v23 = vadd.f32 %v188_v21, %v96_v22 }
  0x96   :  { %v99_v24 = vmax.f32 %v97_v23, 0.0 }
  0x98   :  { %136 = vmatmul.f32.vlgmr.msra.gmra.mxu1 %v99_v24 }
 0x115   :  { %v137_v26 = vpop.f32.mrf.mxu1 }
 0x116   :  { %v138_v27 = vadd.f32 %v189_v25, %v137_v26 }
 0x118   :  { %140 = vmax.xlane.f32.xlu0 %v138_v27 }
 0x18b   :  { %v141_v28 = vpop.xlane.xlu0 %140 }
 0x18c   :  { %v142_v29 = vsub.f32 %v138_v27, %v141_v28 }
 0x18e   :  { %v143_v30 = vmul.f32 1.442695, %v142_v29 }
 0x190   :  { %190 = vpow2.f32 %v143_v30 }
 0x196   :  { %v191_v31 = vpop.eup %190 }
 0x197   :  { %145 = vadd.xlane.f32.xlu0 %v191_v31 }
 0x20a   :  { %v146_v32 = vpop.xlane.xlu0 %145 }
 0x20b   :  { %192 = vrcp.f32 %v146_v32  ;;  %v158_v36 = vand.u32 2147483648, %v146_v32  ;;  %v156_v38 = vand.u32 2147483647, %v146_v32  ;;  %vm152_vm2 = vweird.f32 %v146_v32 }
 0x20d   :  { %v159_v40 = vor.u32 1.1754944e-38, %v158_v36  ;;  %vm157_vm4 = vcmp.eq.f32.partialorder %v156_v38, 8.507059e+37 }
 0x211   :  { %v193_v33 = vpop.eup %192 }
 0x212   :  { %v148_v34 = vmul.f32 %v193_v33, %v146_v32  ;;  %vm153_vm1 = vweird.f32 %v193_v33 }
 0x213   :  { %vm154_vm3 = vmor %vm152_vm2, %vm153_vm1 }
 0x214   :  { %v149_v35 = vsub.f32 1.0, %v148_v34 }
 0x216   :  { %v150_v37 = vmul.f32 %v193_v33, %v149_v35 }
 0x218   :  { %v151_v39 = vadd.f32 %v193_v33, %v150_v37 }
 0x21a   :  { %v155_v41 = vsel %vm154_vm3, %v193_v33, %v151_v39 }
 0x21b   :  { %v160_v42 = vsel %vm157_vm4, %v159_v40, %v155_v41 }
 0x21c   :  { %v161_v43 = vmul.f32 %v191_v31, %v160_v42 }
 0x21e   :  { %162 = vst [vmem:[#allocation8] sm:$0xff] %v161_v43 }
 0x21f   :  { %173 = dma.vmem_to_hbm [thread:$0]  %s169_s4, 128, %s171_s13, [#allocation4]  }
 0x220   :  { %294 = dma.done.wait [#allocation4], 128  }
 0x221   :  { %295 = vsyncadd [#allocation4], 4294967168 }
 0x222   :  { %178 = vsyncpa [#allocation3], 1 }
 0x223   :  { %179 = vsyncpa [#allocation6], 1 }
 0x224   :  { %180 = vsyncpa [#allocation4], 1 }

</bundles_post_ra>
